<compile_context>
chip_gen: v6e
topology: v6e:2x2x1
jax: 0.10.0
libtpu: 0.0.40
codegen_flags: <defaults>
</compile_context>

<pallas_src>
import jax
import jax.numpy as jnp
from jax.experimental import pallas as pl
from jax.experimental.pallas import tpu as pltpu


def gconv_gate_kernel(x_ref, adj_ref, wt_ref, bw_ref, wgx_ref, wgm_ref,
                      bg_ref, out_ref):
    x = x_ref[...]                                   # (Bb, N, F) f32
    bb, n, f = x.shape

    # adj arrives as int8 (exact 0/1 mask) -> widen to MXU-native bf16 only.
    # Weighted (non-binary) graphs arrive as f32 and stay f32 (exact).
    if adj_ref.dtype == jnp.int8:
        adj = adj_ref[...].astype(jnp.bfloat16)      # (Bb, N, N) bf16
    else:
        adj = adj_ref[...]                           # (Bb, N, N) f32

    wt = wt_ref[...]                                 # (F, F) bf16, already W.T
    bw = bw_ref[...]                                 # (1, F) f32
    wgx = wgx_ref[...]                               # (1, F) gate weight, x half
    wgm = wgm_ref[...]                               # (1, F) gate weight, m half
    bg = bg_ref[...]                                 # (1, 1)

    # m = W(x): single (Bb*N, F) @ (F, F) bf16 matmul, f32 accumulation
    # (better MXU occupancy than Bb separate matmuls; W pre-transposed).
    m = jnp.dot(x.reshape(bb * n, f).astype(jnp.bfloat16), wt,
                preferred_element_type=jnp.float32) + bw
    m = m.reshape(bb, n, f)

    # m = relu(adj @ m): bf16 operands straight into the MXU, f32 accumulation.
    m = jnp.maximum(
        jnp.einsum('bij,bjf->bif', adj, m.astype(adj.dtype),
                   preferred_element_type=jnp.float32),
        0.0)

    # coeff = sigmoid(gate(cat([x, m], -1))) == sigmoid(x.wg_x + m.wg_m + bg),
    # computed as a lane reduce (VPU/XLU) -- no concat, no 1-wide matmul.
    g = jnp.sum(x * wgx + m * wgm, axis=-1, keepdims=True) + bg   # (Bb, N, 1)
    coeff = jax.nn.sigmoid(g)

    # coeff * x + (1 - coeff) * m  ==  m + coeff * (x - m)   (one fewer vmul)
    out_ref[...] = (m + coeff * (x - m)).astype(out_ref.dtype)


def _vmem_capacity_bytes():
    try:
        return int(pltpu.get_tpu_info().vmem_capacity_bytes)
    except Exception:
        return 64 << 20          # conservative: v7x per-TensorCore VMEM


def _pick_batch_block(B, N, F, x_bytes, adj_hbm_bytes, out_bytes):
    """Largest Bb (divisor of B) whose pipelined working set fits ~1/3 of this
    generation's VMEM, capped so there are >= min(4, B) grid steps (pipeline
    overlap + work for both v7x TensorCores)."""
    vmem_cap = _vmem_capacity_bytes()
    budget = vmem_cap // 3
    per_b = (2 * (N * F * x_bytes            # x block (double-buffered)
                  + N * N * adj_hbm_bytes    # adj block in its HBM dtype
                  + N * F * out_bytes)       # out block
             + N * N * 2                     # adj widened to bf16 in-kernel
             + 3 * N * F * 4)                # f32 m + combine temps
    bb = max(1, min(B, budget // max(per_b, 1)))
    bb = min(bb, max(1, B // min(4, B)))     # keep >= min(4, B) grid steps
    while B % bb != 0:
        bb -= 1
    return bb, vmem_cap, per_b


def gconv_gate(x, adj, w, bw, wg, bg, *, adj_is_binary=True):
    B, N, F = x.shape
    assert w.shape == (F, F), (
        "GConv_gate forward only type-checks when n_in_feature == n_out_feature")
    assert bw.shape == (1, F) and wg.shape == (1, 2 * F) and bg.shape == (1, 1)

    # Pad node dim to a multiple of 8 so in-kernel reshapes are free layout
    # collapses (padded rows/cols are zero and get sliced off the output).
    N_pad = -(-N // 8) * 8
    if N_pad != N:
        x = jnp.pad(x, ((0, 0), (0, N_pad - N), (0, 0)))
        adj = jnp.pad(adj, ((0, 0), (0, N_pad - N), (0, N_pad - N)))

    # One-time XLA-side layout / dtype work (hoisted out of the kernel):
    wt = jnp.asarray(w).T.astype(jnp.bfloat16)   # (F_in, F_out): kernel does x @ wt
    wgx = wg[:, :F]                              # gate weight acting on x
    wgm = wg[:, F:]                              # gate weight acting on m
    if adj_is_binary:
        adj_hbm = adj.astype(jnp.int8)           # 0/1 mask: exact, minimal HBM bytes
        adj_bytes = 1
    else:
        adj_hbm = adj.astype(jnp.float32)        # weighted graph: keep exact f32
        adj_bytes = 4

    x_bytes = jnp.dtype(x.dtype).itemsize
    out_bytes = x_bytes
    Bb, vmem_cap, per_b = _pick_batch_block(B, N_pad, F, x_bytes, adj_bytes,
                                            out_bytes)
    grid = (B // Bb,)

    weight_bytes = F * F * 2 + (3 * F + 1) * 4          # bf16 W.T + f32 bias/gate
    est_vmem = Bb * per_b + 2 * weight_bytes
    vmem_limit = int(min(vmem_cap, max(2 * est_vmem, 32 << 20)))

    # Grid-invariant weights: single-buffer (their block index never changes).
    weight_mode = pl.Buffered(1)

    out = pl.pallas_call(
        gconv_gate_kernel,
        out_shape=jax.ShapeDtypeStruct((B, N_pad, F), x.dtype),
        grid=grid,
        in_specs=[
            pl.BlockSpec((Bb, N_pad, F), lambda b: (b, 0, 0)),        # x
            pl.BlockSpec((Bb, N_pad, N_pad), lambda b: (b, 0, 0)),    # adj
            pl.BlockSpec((F, F), lambda b: (0, 0),
                         pipeline_mode=weight_mode),                  # W.T (bf16)
            pl.BlockSpec((1, F), lambda b: (0, 0),
                         pipeline_mode=weight_mode),                  # b_W
            pl.BlockSpec((1, F), lambda b: (0, 0),
                         pipeline_mode=weight_mode),                  # gate W (x half)
            pl.BlockSpec((1, F), lambda b: (0, 0),
                         pipeline_mode=weight_mode),                  # gate W (m half)
            pl.BlockSpec((1, 1), lambda b: (0, 0),
                         pipeline_mode=weight_mode),                  # gate b
        ],
        out_specs=pl.BlockSpec((Bb, N_pad, F), lambda b: (b, 0, 0)),
        compiler_params=pltpu.CompilerParams(
            dimension_semantics=("parallel",),
            vmem_limit_bytes=vmem_limit),
    )(x, adj_hbm, wt, bw, wgx, wgm, bg)

    if N_pad != N:
        out = out[:, :N, :]
    return out


def gconv_gate_ref(x, adj, w, bw, wg, bg):
    m = x @ w.T + bw                                    # W(x)
    m = jax.nn.relu(jnp.einsum('xjk,xkl->xjl', adj, m))
    coeff = jax.nn.sigmoid(jnp.concatenate([x, m], -1) @ wg.T + bg)
    return coeff * x + (1.0 - coeff) * m


if __name__ == "__main__":
    B, N, F = 2, 8, 32          # n_in_feature == n_out_feature == F
    key = jax.random.PRNGKey(0)
    kx, ka, kw, kbw, kwg, kbg = jax.random.split(key, 6)

    x = jax.random.normal(kx, (B, N, F), dtype=jnp.float32)
    adj = (jax.random.uniform(ka, (B, N, N), dtype=jnp.float32) > 0.5
           ).astype(jnp.float32)

    # Deterministic parameter init (shapes from nn.Linear in __init__).
    w = jax.random.normal(kw, (F, F), dtype=jnp.float32) * (1.0 / jnp.sqrt(F))
    bw = jax.random.normal(kbw, (1, F), dtype=jnp.float32) * 0.1
    wg = jax.random.normal(kwg, (1, 2 * F), dtype=jnp.float32) * (1.0 / jnp.sqrt(2 * F))
    bg = jax.random.normal(kbg, (1, 1), dtype=jnp.float32) * 0.1

    out = gconv_gate(x, adj, w, bw, wg, bg)
    jax.block_until_ready(out)

    ref = gconv_gate_ref(x, adj, w, bw, wg, bg)
    assert out.shape == (B, N, F)
    # bf16 MXU operands (with f32 accumulation) are intentionally not
    # bit-identical to the f32 reference -> loosened tolerance.
    max_err = float(jnp.max(jnp.abs(out - ref)))
    assert jnp.allclose(out, ref, atol=5e-2, rtol=5e-2), max_err
    print("KERNEL_OK")
</pallas_src>

<mosaic_0001>
module attributes {stable_mosaic.version = 11 : i64} {
  func.func @gconv_gate_kernel(%arg0: i32, %arg1: memref<1x8x32xf32, #tpu.memory_space<vmem>>, %arg2: memref<1x8x8xi8, #tpu.memory_space<vmem>>, %arg3: memref<32x32xbf16, #tpu.memory_space<vmem>>, %arg4: memref<1x32xf32, #tpu.memory_space<vmem>>, %arg5: memref<1x32xf32, #tpu.memory_space<vmem>>, %arg6: memref<1x32xf32, #tpu.memory_space<vmem>>, %arg7: memref<1x1xf32, #tpu.memory_space<vmem>>, %arg8: memref<1x8x32xf32, #tpu.memory_space<vmem>>) attributes {dimension_semantics = [#tpu.dimension_semantics<parallel>], iteration_bounds = array<i64: 2>, scalar_prefetch = 0 : i64, scratch_operands = 0 : i64, tpu.core_type = #tpu.core_type<tc>, window_params = [{transform_indices = @transform_0, window_bounds = array<i64: 1, 8, 32>}, {transform_indices = @transform_1, window_bounds = array<i64: 1, 8, 8>}, {pipeline_mode = #tpu.pipeline_mode<synchronous>, transform_indices = @transform_2, window_bounds = array<i64: 32, 32>}, {pipeline_mode = #tpu.pipeline_mode<synchronous>, transform_indices = @transform_3, window_bounds = array<i64: 1, 32>}, {pipeline_mode = #tpu.pipeline_mode<synchronous>, transform_indices = @transform_4, window_bounds = array<i64: 1, 32>}, {pipeline_mode = #tpu.pipeline_mode<synchronous>, transform_indices = @transform_5, window_bounds = array<i64: 1, 32>}, {pipeline_mode = #tpu.pipeline_mode<synchronous>, transform_indices = @transform_6, window_bounds = array<i64: 1, 1>}, {transform_indices = @transform_7, window_bounds = array<i64: 1, 8, 32>}]} {
    %c0 = arith.constant 0 : index
    %c0_0 = arith.constant 0 : index
    %c0_1 = arith.constant 0 : index
    %0 = vector.load %arg1[%c0, %c0_0, %c0_1] : memref<1x8x32xf32, #tpu.memory_space<vmem>>, vector<1x8x32xf32>
    %c0_2 = arith.constant 0 : index
    %c0_3 = arith.constant 0 : index
    %c0_4 = arith.constant 0 : index
    %1 = vector.load %arg2[%c0_2, %c0_3, %c0_4] : memref<1x8x8xi8, #tpu.memory_space<vmem>>, vector<1x8x8xi8>
    %2 = arith.sitofp %1 : vector<1x8x8xi8> to vector<1x8x8xbf16>
    %c0_5 = arith.constant 0 : index
    %c0_6 = arith.constant 0 : index
    %3 = vector.load %arg3[%c0_5, %c0_6] : memref<32x32xbf16, #tpu.memory_space<vmem>>, vector<32x32xbf16>
    %c0_7 = arith.constant 0 : index
    %c0_8 = arith.constant 0 : index
    %4 = vector.load %arg4[%c0_7, %c0_8] : memref<1x32xf32, #tpu.memory_space<vmem>>, vector<1x32xf32>
    %c0_9 = arith.constant 0 : index
    %c0_10 = arith.constant 0 : index
    %5 = vector.load %arg5[%c0_9, %c0_10] : memref<1x32xf32, #tpu.memory_space<vmem>>, vector<1x32xf32>
    %c0_11 = arith.constant 0 : index
    %c0_12 = arith.constant 0 : index
    %6 = vector.load %arg6[%c0_11, %c0_12] : memref<1x32xf32, #tpu.memory_space<vmem>>, vector<1x32xf32>
    %c0_13 = arith.constant 0 : index
    %c0_14 = arith.constant 0 : index
    %7 = vector.load %arg7[%c0_13, %c0_14] : memref<1x1xf32, #tpu.memory_space<vmem>>, vector<1x1xf32>
    %8 = vector.shape_cast %0 : vector<1x8x32xf32> to vector<8x32xf32>
    %9 = arith.truncf %8 : vector<8x32xf32> to vector<8x32xbf16>
    %cst = arith.constant dense<0.000000e+00> : vector<8x32xf32>
    %10 = tpu.matmul %9, %3, %cst {dimension_numbers = #tpu.dot_dimension_numbers<[1], [0], [0], [1], [0, 0, 1, 1], [], []>} : vector<8x32xbf16>, vector<32x32xbf16>, vector<8x32xf32> -> vector<8x32xf32>
    %11 = vector.broadcast %4 : vector<1x32xf32> to vector<8x32xf32>
    %12 = arith.addf %10, %11 : vector<8x32xf32>
    %13 = vector.shape_cast %12 : vector<8x32xf32> to vector<1x8x32xf32>
    %14 = arith.truncf %13 : vector<1x8x32xf32> to vector<1x8x32xbf16>
    "tpu.trace_start"() <{level = 10 : i32, message = "bij,bjf->bif"}> : () -> ()
    %cst_15 = arith.constant dense<0.000000e+00> : vector<1x8x32xf32>
    %15 = tpu.matmul %2, %14, %cst_15 {dimension_numbers = #tpu.dot_dimension_numbers<[2], [1], [1], [2], [0, 0, 0, 1, 1, 2], [0], [0]>} : vector<1x8x8xbf16>, vector<1x8x32xbf16>, vector<1x8x32xf32> -> vector<1x8x32xf32>
    "tpu.trace_stop"() : () -> ()
    %cst_16 = arith.constant 0.000000e+00 : f32
    %16 = vector.broadcast %cst_16 : f32 to vector<1x8x32xf32>
    %17 = arith.maximumf %15, %16 : vector<1x8x32xf32>
    %18 = vector.shape_cast %5 : vector<1x32xf32> to vector<1x1x32xf32>
    %19 = vector.broadcast %18 : vector<1x1x32xf32> to vector<1x8x32xf32>
    %20 = arith.mulf %0, %19 : vector<1x8x32xf32>
    %21 = vector.shape_cast %6 : vector<1x32xf32> to vector<1x1x32xf32>
    %22 = vector.broadcast %21 : vector<1x1x32xf32> to vector<1x8x32xf32>
    %23 = arith.mulf %17, %22 : vector<1x8x32xf32>
    %24 = arith.addf %20, %23 : vector<1x8x32xf32>
    %cst_17 = arith.constant dense<0.000000e+00> : vector<1x8xf32>
    %25 = vector.multi_reduction <add>, %24, %cst_17 [2] : vector<1x8x32xf32> to vector<1x8xf32>
    %26 = vector.shape_cast %25 : vector<1x8xf32> to vector<1x8x1xf32>
    %27 = vector.shape_cast %7 : vector<1x1xf32> to vector<1x1x1xf32>
    %28 = vector.broadcast %27 : vector<1x1x1xf32> to vector<1x8x1xf32>
    %29 = arith.addf %26, %28 : vector<1x8x1xf32>
    %30 = arith.negf %29 : vector<1x8x1xf32>
    %31 = math.exp %30 : vector<1x8x1xf32>
    %cst_18 = arith.constant 1.000000e+00 : f32
    %32 = vector.broadcast %cst_18 : f32 to vector<1x8x1xf32>
    %33 = arith.addf %32, %31 : vector<1x8x1xf32>
    %34 = arith.divf %32, %33 : vector<1x8x1xf32>
    %35 = arith.subf %0, %17 : vector<1x8x32xf32>
    %36 = vector.broadcast %34 : vector<1x8x1xf32> to vector<1x8x32xf32>
    %37 = arith.mulf %36, %35 : vector<1x8x32xf32>
    %38 = arith.addf %17, %37 : vector<1x8x32xf32>
    %c0_19 = arith.constant 0 : index
    %c0_20 = arith.constant 0 : index
    %c0_21 = arith.constant 0 : index
    %39 = vector.load %arg8[%c0_19, %c0_20, %c0_21] : memref<1x8x32xf32, #tpu.memory_space<vmem>>, vector<1x8x32xf32>
    tpu.vector_store %arg8[%c0_19, %c0_20, %c0_21], %38 {strides = array<i32>} : memref<1x8x32xf32, #tpu.memory_space<vmem>>, vector<1x8x32xf32>,
    return
  }
  func.func @transform_0(%arg0: i32) -> (i32, i32, i32) {
    %c0_i32 = arith.constant 0 : i32
    %c0_i32_0 = arith.constant 0 : i32
    %c0_i32_1 = arith.constant 0 : i32
    return %arg0, %c0_i32, %c0_i32_0 : i32, i32, i32
  }
  func.func @transform_1(%arg0: i32) -> (i32, i32, i32) {
    %c0_i32 = arith.constant 0 : i32
    %c0_i32_0 = arith.constant 0 : i32
    %c0_i32_1 = arith.constant 0 : i32
    return %arg0, %c0_i32, %c0_i32_0 : i32, i32, i32
  }
  func.func @transform_2(%arg0: i32) -> (i32, i32) {
    %c0_i32 = arith.constant 0 : i32
    %c0_i32_0 = arith.constant 0 : i32
    %c0_i32_1 = arith.constant 0 : i32
    return %c0_i32, %c0_i32_0 : i32, i32
  }
  func.func @transform_3(%arg0: i32) -> (i32, i32) {
    %c0_i32 = arith.constant 0 : i32
    %c0_i32_0 = arith.constant 0 : i32
    %c0_i32_1 = arith.constant 0 : i32
    return %c0_i32, %c0_i32_0 : i32, i32
  }
  func.func @transform_4(%arg0: i32) -> (i32, i32) {
    %c0_i32 = arith.constant 0 : i32
    %c0_i32_0 = arith.constant 0 : i32
    %c0_i32_1 = arith.constant 0 : i32
    return %c0_i32, %c0_i32_0 : i32, i32
  }
  func.func @transform_5(%arg0: i32) -> (i32, i32) {
    %c0_i32 = arith.constant 0 : i32
    %c0_i32_0 = arith.constant 0 : i32
    %c0_i32_1 = arith.constant 0 : i32
    return %c0_i32, %c0_i32_0 : i32, i32
  }
  func.func @transform_6(%arg0: i32) -> (i32, i32) {
    %c0_i32 = arith.constant 0 : i32
    %c0_i32_0 = arith.constant 0 : i32
    %c0_i32_1 = arith.constant 0 : i32
    return %c0_i32, %c0_i32_0 : i32, i32
  }
  func.func @transform_7(%arg0: i32) -> (i32, i32, i32) {
    %c0_i32 = arith.constant 0 : i32
    %c0_i32_0 = arith.constant 0 : i32
    %c0_i32_1 = arith.constant 0 : i32
    return %arg0, %c0_i32, %c0_i32_0 : i32, i32, i32
  }
}

</mosaic_0001>

<bundles_post_ra>
// kernel: tpu_custom_call.1
= control target key start
LH: loop header
LB: loop body
LE: loop exit
PB: predicated region body
PF: predicated region fallthrough
CT: control target
= control target key end

     0   :  { %s1169_s0 = inlined_call_operand.hbm [shape: f32[2,8,32], index: 0, kind: input, shape index: {}]   ;;  %s1170_s1 = inlined_call_operand.hbm [shape: s8[2,8,8], index: 1, kind: input, shape index: {}]   ;;  %s1171_s2 = inlined_call_operand.hbm [shape: bf16[32,32], index: 2, kind: input, shape index: {}]   ;;  %s1172_s3 = inlined_call_operand.vmem [shape: f32[1,32], index: 3, kind: input, shape index: {}]   ;;  %s1173_s4 = inlined_call_operand.vmem [shape: f32[1,32], index: 4, kind: input, shape index: {}]   ;;  %s1174_s5 = inlined_call_operand.vmem [shape: f32[1,32], index: 5, kind: input, shape index: {}]   ;;  %s1175_s6 = inlined_call_operand.<no memory space> [shape: f32[1,1], index: 6, kind: input, shape index: {}]   ;;  %s1176_s7 = inlined_call_operand.hbm [shape: f32[2,8,32], index: 7, kind: output, shape index: {}]  }
   0x1   :  { %1181 = sst [smem:[#allocation14_spill]] %s1169_s0  ;;  %v12_v0 = vstv %s1175_s6 }
   0x2   :  { %1182 = sst [smem:[#allocation15_spill]] %s1171_s2  ;;  %13 = vst [vmem:[#allocation2] sm:$0x1] %v12_v0 }
   0x3   :  { %14 = vsyncpa [#allocation4], 0 }
   0x4   :  { %16 = vsyncpa [#allocation4 + $0x1], 0 }
   0x5   :  { %17 = vsyncpa [#allocation7], 0 }
   0x6   :  { %19 = vsyncpa [#allocation7 + $0x1], 0 }
   0x7   :  { %20 = vsyncpa [#allocation5], 0 }
   0x8   :  { %22 = vsyncpa [#allocation5 + $0x1], 0  ;;  %s955_s26 = smov 0   ;;  %s957_s27 = smov 0  }
   0x9   :  { %s959_s28 = smov 0   ;;  %s961_s29 = smov 0  }
   0xa LB: > { %s976_s6 = sadd.s32 4294967295, %s901_s29   ;;  %s628_s30 = sadd.s32 4294967294, %s901_s29   ;;  %s901_s29 = sphi %s961_s29, %s1203_s29   ;;  %s897_s28 = sphi %s959_s28, %s1202_s28   ;;  %s893_s27 = sphi %s957_s27, %s1201_s27   ;;  %s889_s26 = sphi %s955_s26, %s1200_s26  }
   0xb   : > { %p48_p0 = scmp.ne.s32.totalorder %s893_s27, %s889_s26  ;;  %p1177_p1 = scmp.eq.s32.totalorder %s976_s6, 0 }
   0xc   : > { %p209_p3 = scmp.eq.s32.totalorder %s628_s30, 1  ;;  %p629_p5 = scmp.ge.s32.totalorder %s901_s29, 1 }
   0xd   : > { %p985_p4 = por %p1177_p1, %p48_p0  ;;  %p216_p7 = scmp.lt.s32.totalorder %s901_s29, 3 }
   0xe   : > { %p990_p6 = por %p209_p3, %p48_p0  ;;  %s903_s11 = smov [#allocation8]  }
   0xf   : > { %s1183_s8 = scalar_select %p985_p4, 1, 0 }
  0x10   : > { %s1184_s9 = scalar_select %p990_p6, 1, 0 }
  0x11   : > { %p995_p8 = pnand %p629_p5, %p216_p7  ;;  %s228_s12 = sshll.u32 %s903_s11, 4  ;;  %s229_s12 = int_to_ptr.vmem [resolvable:$true] %s228_s12 }
  0x12   : > { %s1009_s14 = sadd.s32 1, %s901_s29   ;;  %s35_s15 = sadd.s32 1, %s897_s28 }
  0x13   : > { %s1185_s10 = scalar_select %p995_p8, 1, 0 }
  0x14   : > { %p683_p9 = pneg %p995_p8  ;;  %s32_s16 = ssub.s32 %s901_s29, %s1009_s14 }
  0x15   : > { %s758_s17 = scalar_lea.vmem %s229_s12, 256  ;;  %p766_p5 = scmp.lt.s32.totalorder %s229_s12, %s229_s12 }
  0x16   : > { %p1004_p11 = pnand %p683_p9, %p1177_p1  ;;  %p759_p13 = scmp.ne.s32.totalorder %s229_s12, %s758_s17 }
  0x17   : > { %p767_p7 = scmp.lt.s32.totalorder %s758_s17, %s758_s17 }
  0x18   : > { %p749_p12 = pneg %p1004_p11 }
  0x19   : > { %p768_p10 = por %p767_p7, %p766_p5 }
  0x1a   : > { %p761_p0 = pnand %p759_p13, %p749_p12 }
  0x1c   : > { %p762_p3 = pneg %p761_p0 }
  0x1e   : > { %p769_p2 = pnand %p768_p10, %p762_p3 }
  0x20   : > { %772 = shalt.err (!%p769_p2)
}
  0x21   : > { %s904_s18 = smov 64   ;;  %s905_s19 = smov 4  }
  0x22   : > { %s1187_s2 = sld [smem:[#allocation15_spill]]  ;;  %p33_p9 = scmp.eq.s32.totalorder %s32_s16, 0 }
  0x23   : > { %p42_p10 = scmp.ne.s32.totalorder %s897_s28, %s893_s27  ;;  %p43_p2 = scmp.eq.s32.totalorder %s901_s29, 0 }
  0x24   : > { %p699_p12 = scmp.lt.s32.totalorder %s901_s29, 2  ;;  %p1188_p0 = scmp.eq.s32.totalorder %s976_s6, 1 }
  0x25   : > { %s1026_s22 = scalar_select %p33_p9, %s897_s28, %s35_s15  }
  0x26   : > { %p44_p13 = por %p43_p2, %p42_p10  ;;  %p1030_p3 = por %p1188_p0, %p42_p10 }
  0x27   : > { %s1035_s24 = sand.u32 1, %s897_s28   ;;  %s633_s25 = sshll.u32 %s901_s29, 7 }
  0x28   : > { %686 = dma.hbm_to_vmem [thread:$0]  (!%p1004_p11), %s1187_s2, 256, %s229_s12, [#allocation7], %s904_s18, %s904_s18, %s905_s19  }
  0x29   : > { %s1189_s23 = scalar_select %p1030_p3, 1, 0 }
  0x2a   : > { %s632_s30 = sshll.u32 %s1035_s24, 3  ;;  %s1190_s0 = sld [smem:[#allocation14_spill]] }
  0x2b   : > { %s258_s15 = scalar_lea.vmem [#allocation3], %s632_s30  ;;  %p1044_p11 = pnand %p699_p12, %p44_p13 }
  0x2c   : > { %s265_s16 = sshll.u32 %s258_s15, 4  ;;  %s255_s19 = scalar_lea.sflag [#allocation4], %s1035_s24  ;;  %s266_s16 = int_to_ptr.vmem [resolvable:$true] %s265_s16 }
  0x2d   : > { %p775_p7 = pneg %p1044_p11 }
  0x30   : > { %s1042_s13 = scalar_lea.hbm %s1190_s0, %s633_s25  ;;  %s778_s30 = scalar_lea.hbm %s1190_s0, 256 }
  0x31   : > { %s773_s20 = scalar_lea.hbm %s1042_s13, 128  ;;  %p779_p2 = scmp.lt.s32.totalorder %s1042_s13, %s1190_s0 }
  0x32   : > { %p774_p5 = scmp.ne.s32.totalorder %s1042_s13, %s773_s20  ;;  %p780_p12 = scmp.lt.s32.totalorder %s778_s30, %s773_s20 }
  0x34   : > { %p776_p9 = pnand %p775_p7, %p774_p5  ;;  %p781_p13 = por %p780_p12, %p779_p2 }
  0x36   : > { %p777_p10 = pneg %p776_p9 }
  0x38   : > { %p782_p0 = pnand %p781_p13, %p777_p10 }
  0x3a   : > { %785 = shalt.err (!%p782_p0)
}
  0x3b   : > { %s786_s15 = scalar_lea.vmem %s266_s16, 128  ;;  %s906_s18 = smov [#allocation3]  }
  0x3c   : > { %p787_p1 = scmp.ne.s32.totalorder %s266_s16, %s786_s15  ;;  %s791_s2 = sshll.u32 %s906_s18, 4  ;;  %s792_s2 = int_to_ptr.vmem [resolvable:$false] %s791_s2 }
  0x3d   : > { %s793_s21 = scalar_lea.vmem %s792_s2, 256  ;;  %p794_p9 = scmp.lt.s32.totalorder %s266_s16, %s792_s2 }
  0x3e   : > { %p789_p6 = pnand %p787_p1, %p775_p7  ;;  %p795_p3 = scmp.lt.s32.totalorder %s793_s21, %s786_s15 }
  0x40   : > { %p790_p5 = pneg %p789_p6  ;;  %p796_p4 = por %p795_p3, %p794_p9 }
  0x42   : > { %p797_p8 = pnand %p796_p4, %p790_p5 }
  0x44   : > { %800 = shalt.err (!%p797_p8)
}
  0x45   : > { %690 = dma.hbm_to_vmem [thread:$0]  (!%p1044_p11), %s1042_s13, 128, %s266_s16, %s255_s19  }
  0x46   : > { %s634_s20 = sshll.u32 %s1035_s24, 1  ;;  %s635_s25 = sshll.u32 %s901_s29, 5 }
  0x47   : > { %s1075_s18 = scalar_lea.hbm %s1170_s1, %s635_s25  ;;  %s276_s2 = scalar_lea.vmem [#allocation6], %s634_s20 }
  0x48   : > { %s283_s12 = sshll.u32 %s276_s2, 4  ;;  %s1192_s15 = sand.u32 1, %s901_s29   ;;  %s284_s12 = int_to_ptr.vmem [resolvable:$true] %s283_s12 }
  0x49   : > { %s273_s21 = scalar_lea.sflag [#allocation7], %s1192_s15  ;;  %s801_s0 = scalar_lea.hbm %s1075_s18, 32 }
  0x4a   : > { %p802_p1 = scmp.ne.s32.totalorder %s1075_s18, %s801_s0  ;;  %s806_s16 = scalar_lea.hbm %s1170_s1, 64 }
  0x4b   : > { %p807_p8 = scmp.lt.s32.totalorder %s1075_s18, %s1170_s1  ;;  %p808_p3 = scmp.lt.s32.totalorder %s806_s16, %s801_s0 }
  0x4c   : > { %p804_p4 = pnand %p802_p1, %p775_p7 }
  0x4d   : > { %p809_p10 = por %p808_p3, %p807_p8 }
  0x4e   : > { %p805_p6 = pneg %p804_p4 }
  0x50   : > { %p810_p2 = pnand %p809_p10, %p805_p6 }
  0x52   : > { %813 = shalt.err (!%p810_p2)
}
  0x53   : > { %s814_s20 = scalar_lea.vmem %s284_s12, 32  ;;  %s907_s30 = smov [#allocation6]  }
  0x54   : > { %p815_p12 = scmp.ne.s32.totalorder %s284_s12, %s814_s20  ;;  %s819_s11 = sshll.u32 %s907_s30, 4  ;;  %s820_s11 = int_to_ptr.vmem [resolvable:$false] %s819_s11 }
  0x55   : > { %s821_s2 = scalar_lea.vmem %s820_s11, 64  ;;  %p822_p5 = scmp.lt.s32.totalorder %s284_s12, %s820_s11 }
  0x56   : > { %p817_p13 = pnand %p815_p12, %p775_p7  ;;  %p823_p9 = scmp.lt.s32.totalorder %s821_s2, %s814_s20 }
  0x58   : > { %p818_p0 = pneg %p817_p13  ;;  %p824_p1 = por %p823_p9, %p822_p5 }
  0x5a   : > { %p825_p4 = pnand %p824_p1, %p818_p0 }
  0x5c   : > { %828 = shalt.err (!%p825_p4)
}
  0x5d   : > { %693 = dma.hbm_to_vmem [thread:$0]  (!%p1044_p11), %s1075_s18, 32, %s284_s12, %s273_s21  }
  0x5e   : > { %p1193_p6 = scmp.ne.s32.totalorder %s1185_s10, 0 }
  0x5f   : > { %s1100_s0 = sand.u32 (!%p1193_p6), 1, %s893_s27   ;;  %p1194_p7 = scmp.ne.s32.totalorder (!%p1193_p6), %s1183_s8, 0 }
  0x60   : > { %292 = sbr.rel (%p1193_p6) target bundleno = 832 (0x340), region = 48  ;;  %s637_s15 = sshll.u32 (!%p1193_p6), %s1100_s0, 3 }
  0x61   : > { %s295_s24 = scalar_lea.sflag (!%p1193_p6), [#allocation4], %s1100_s0  ;;  %s298_s13 = scalar_lea.vmem (!%p1193_p6), [#allocation3], %s637_s15 }
  0x65   : > { %872 = dma.done.wait (%p1194_p7), %s295_s24, 128  }
  0x66   : > { %874 = vsyncadd (%p1194_p7), %s295_s24, 4294967168  ;;  %s303_s10 = sand.u32 1, %s976_s6   ;;  %s638_s17 = sshll.u32 %s1100_s0, 1 }
  0x67   : > { %s304_s18 = scalar_lea.sflag [#allocation7], %s303_s10  ;;  %s307_s12 = scalar_lea.vmem [#allocation6], %s638_s17 }
  0x68   : > { %876 = dma.done.wait (%p1194_p7), %s304_s18, 32  }
  0x69   : > { %878 = vsyncadd (%p1194_p7), %s304_s18, 4294967264  ;;  %p1195_p11 = scmp.eq.s32.totalorder %s976_s6, 0 }
  0x6b   : > { %880 = dma.done.wait (%p1195_p11), [#allocation7], 256   ;;  %p1196_p8 = pmov %p1195_p11 }
  0x6c   : > { %v908_v1 = vmov 0.0   ;;  %vm909_vm0 = vmmov 0   ;;  %v741_v2 = vld [vmem:[#allocation8 + $0x8] sm:$0xff]   ;;  %v742_v3 = vld [vmem:[#allocation8] sm:$0xff]   ;;  %vm378_vm1 = vcmask 261120   ;;  %vm427_vm2 = vcmask 1043456  }
  0x6d   : > { %882 = vsyncadd (%p1196_p8), [#allocation7], 4294967040  ;;  %659 = vmatprep.subr.bf16.mxu0 %v908_v1  ;;  %663 = vmatprep.mubr.msk.bf16.mxu0 %vm909_vm0, %v908_v1  ;;  %v348_v4 = vld [vmem:[%s298_s13] sm:$0xff]  ;;  %v641_v6 = vld [vmem:[%s1172_s3] ss:$0 sm:$0xff]  ;;  %vm423_vm3 = vcmask 64512  }
  0x6e   : > { %667 = vmatprep.subr.bf16.mxu1 %v908_v1  ;;  %669 = vmatprep.mubr.msk.bf16.mxu1 %vm909_vm0, %v908_v1  ;;  %v359_v5 = vpack.c.bf16 %v348_v4, %v348_v4  ;;  %v349_v10 = vld [vmem:[%s307_s12] sm:$0x3]  ;;  %v646_v16 = vld [vmem:[%s1173_s4] ss:$0 sm:$0xff]  ;;  %v910_v27 = vmov 0   ;;  %s651_s30 = sshll.u32 %s976_s6, 7 }
  0x6f   : > { %660 = vmatpush3.bf16.msra.mxu0 %v741_v2  ;;  %v350_v14 = vunpack.c.l.s8.bf16 %v349_v10  ;;  %v647_v18 = vld [vmem:[%s1174_s5] ss:$0 sm:$0xff]  ;;  %v478_v20 = vmul.f32 %v646_v16, %v348_v4  ;;  %740 = vset.pattern.permute.xlu0 %v910_v27  ;;  %s346_s11 = scalar_lea.vmem [#allocation9], %s637_s15  ;;  %s524_s10 = scalar_lea.hbm %s1176_s7, %s651_s30 }
  0x70   : > { %661 = vmatprep.subr.bf16.mxu0 %v908_v1  ;;  %v648_v28 = vld [vmem:[#allocation2] ss:$0 sm:$0xff]  ;;  %s526_s2 = sshll.u32 %s346_s11, 4  ;;  %s513_s17 = scalar_lea.sflag [#allocation5], %s1100_s0  ;;  %s527_s2 = int_to_ptr.vmem [resolvable:$true] %s526_s2 }
  0x71   : > { %s829_s18 = scalar_lea.vmem %s527_s2, 128  ;;  %p1197_p10 = scmp.ne.s32.totalorder %s1189_s23, 0 }
  0x72   : > { %p830_p3 = scmp.ne.s32.totalorder %s527_s2, %s829_s18  ;;  %s911_s12 = smov [#allocation9]  }
  0x73   : > { %662 = vmatpush3.bf16.msra.mxu0 %v742_v3  ;;  %s833_s6 = sshll.u32 %s911_s12, 4  ;;  %s834_s6 = int_to_ptr.vmem [resolvable:$false] %s833_s6 }
  0x74   : > { %p831_p2 = pnand %p830_p3, %p1197_p10  ;;  %s835_s15 = scalar_lea.vmem %s834_s6, 256 }
  0x75   : > { %p836_p13 = scmp.lt.s32.totalorder %s527_s2, %s834_s6  ;;  %p837_p0 = scmp.lt.s32.totalorder %s835_s15, %s829_s18 }
  0x76   : > { %664 = vmatmul.mubr.msk.bf16.vlgmr.msra.gmra.mxu0 %vm378_vm1, %v359_v5  ;;  %p832_p12 = pneg %p831_p2 }
  0x77   : > { %p838_p5 = por %p837_p0, %p836_p13 }
  0x79   : > { %p839_p9 = pnand %p838_p5, %p832_p12 }
 0x136   : > { %v416_v7 = vpop.f32.mrf.mxu0 }
 0x137   : > { %v417_v8 = vadd.f32 %v641_v6, %v416_v7 }
 0x138   : > { %v665_v9 = vpop.f32.mrf.mxu0 }
 0x139   : > { %v422_v11 = vpack.c.bf16 %v417_v8, %v417_v8 }
 0x13a   : > { %v419_v12 = vpop.f32.mrf.mxu0 }
 0x13b   : > { %v429_v13 = vsel %vm427_vm2, %v422_v11, 0 }
 0x13c   : > { %v666_v15 = vpop.f32.mrf.mxu0  ;;  %668 = vmatpush3.bf16.msra.mxu1 %v429_v13 }
 0x13f   : > { %670 = vmatmul.mubr.msk.bf16.vlgmr.msra.gmra.mxu1 %vm423_vm3, %v350_v14 }
 0x1ff   : > { %v465_v17 = vpop.f32.mrf.mxu1 }
 0x200   : > { %v471_v19 = vmax.f32 %v465_v17, 0.0 }
 0x201   : > { %v671_v21 = vpop.f32.mrf.mxu1 }
 0x202   : > { %v485_v22 = vmul.f32 %v647_v18, %v471_v19  ;;  %v503_v35 = vsub.f32 %v348_v4, %v471_v19 }
 0x203   : > { %v468_v23 = vpop.f32.mrf.mxu1 }
 0x204   : > { %v486_v24 = vadd.f32 %v485_v22, %v478_v20 }
 0x205   : > { %v672_v25 = vpop.f32.mrf.mxu1 }
 0x206   : > { %v487_v26 = vsel %vm378_vm1, %v486_v24, 0.0 }
 0x207   : > { %488 = vadd.xlane.f32.xlu0 %v487_v26 }
 0x290   : > { %v489_v29 = vpop.xlane.xlu0 %488 }
 0x291   : > { %v496_v30 = vadd.f32 %v648_v28, %v489_v29 }
 0x293   : > { %v649_v31 = vmul.f32 -1.442695, %v496_v30 }
 0x295   : > { %743 = vpow2.f32 %v649_v31 }
 0x2a2   : > { %v744_v32 = vpop.eup %743 }
 0x2a3   : > { %v500_v33 = vadd.f32 1.0, %v744_v32 }
 0x2a5   : > { %745 = vrcp.f32 %v500_v33 }
 0x2b2   : > { %v746_v34 = vpop.eup %745 }
 0x2b3   : > { %506 = vperm.xlu0 %740, %v746_v34  }
 0x32e   : > { %v507_v36 = vpop.permute.xlu0 %506 }
 0x32f   : > { %v509_v37 = vmul.f32 %v507_v36, %v503_v35 }
 0x331   : > { %v510_v38 = vadd.f32 %v509_v37, %v471_v19 }
 0x333   : > { %511 = vst.msk [vmem:[%s346_s11] sm:$0xff] %vm378_vm1, %v510_v38 }
 0x334   : > { %842 = shalt.err (!%p839_p9)
}
 0x335   : > { %s843_s8 = scalar_lea.hbm %s524_s10, 128  ;;  %s847_s16 = scalar_lea.hbm %s1176_s7, 256 }
 0x336   : > { %p844_p1 = scmp.ne.s32.totalorder %s524_s10, %s843_s8  ;;  %p848_p7 = scmp.lt.s32.totalorder %s524_s10, %s1176_s7 }
 0x337   : > { %p849_p11 = scmp.lt.s32.totalorder %s847_s16, %s843_s8 }
 0x338   : > { %p845_p4 = pnand %p844_p1, %p1197_p10 }
 0x339   : > { %p850_p8 = por %p849_p11, %p848_p7 }
 0x33a   : > { %p846_p6 = pneg %p845_p4 }
 0x33c   : > { %p851_p3 = pnand %p850_p8, %p846_p6 }
 0x33e   : > { %854 = shalt.err (!%p851_p3)
}
 0x33f   : > { %681 = dma.vmem_to_hbm [thread:$0]  (%p1197_p10), %s527_s2, 128, %s524_s10, %s513_s17  }
 0x340 PF: > { %s538_s20 = sand.u32 1, %s889_s26   ;;  %p1198_p2 = scmp.ne.s32.totalorder %s1184_s9, 0 }
 0x341   : > { %p1199_p12 = scmp.ge.s32.totalorder %s901_s29, 2  ;;  %s539_s30 = scalar_lea.sflag [#allocation5], %s538_s20 }
 0x343   : > { %p695_p13 = pnand %p1199_p12, %p1198_p2 }
 0x345   : > { %p696_p0 = pneg %p695_p13 }
 0x347   : > { %884 = dma.done.wait (%p696_p0), %s539_s30, 128  }
 0x348   : > { %886 = vsyncadd (%p696_p0), %s539_s30, 4294967168  ;;  %p25_p5 = scmp.ge.s32.totalorder %s1009_s14, 4   ;;  %s1200_s26 = smov %s893_s27 }
 0x349   : > { %s1201_s27 = smov %s897_s28  ;;  %s1202_s28 = smov %s1026_s22 }
 0x34a   : > { %s1203_s29 = smov %s1009_s14  ;;  %27 = sbr.rel (!%p25_p5) target bundleno = 10 (0xa), region = 110 }
 0x34f   :  { %544 = vsyncpa [#allocation4], 1 }
 0x350   :  { %546 = vsyncpa [#allocation4 + $0x1], 1 }
 0x351   :  { %547 = vsyncpa [#allocation7], 1 }
 0x352   :  { %549 = vsyncpa [#allocation7 + $0x1], 1 }
 0x353   :  { %550 = vsyncpa [#allocation5], 1 }
 0x354   :  { %552 = vsyncpa [#allocation5 + $0x1], 1 }

</bundles_post_ra>
